<compile_context>
chip_gen: v7x
topology: tpu7x:2x2x1
jax: 0.10.0
libtpu: 0.0.40
codegen_flags: <defaults>
</compile_context>

<pallas_src>
import jax
import jax.numpy as jnp
from jax.experimental import pallas as pl
from jax.experimental.pallas import tpu as pltpu


def _sublane_align(dtype) -> int:
    # Native TPU tiling: (8,128) for 4-byte dtypes, (16,128) for 2-byte, (32,128) for 1-byte.
    return max(8, 32 // jnp.dtype(dtype).itemsize)


def _budgets():
    """Return (per-stream tile bytes, vmem_limit_bytes) derived from chip VMEM."""
    try:
        info = pltpu.get_tpu_info()
        cap = int(getattr(info, "vmem_capacity_bytes", 0)) or (64 << 20)
    except Exception:  # interpret mode / AOT on CPU
        cap = 64 << 20
    # v5e/v6e (128 MiB VMEM) -> 8 MiB tiles; v7x (64 MiB VMEM) -> 4 MiB tiles.
    tile = max(2 << 20, min(8 << 20, cap // 16))
    vmem_limit = int(min(cap // 2, max(32 << 20, 8 * tile)))
    return tile, vmem_limit


def _mul_kernel(x_ref, s_ref, o_ref):
    # s_ref is (1,1), (row_tile,1), (1,lane_tile) or (row_tile,lane_tile);
    # jnp broadcasting + dtype promotion handle every case; cast once at store.
    o_ref[...] = (x_ref[...] * s_ref[...]).astype(o_ref.dtype)


def _tiled_mul_2d(x2, s2, out_dtype):
    """out2 = x2 * s2 where s2.shape is (1,1), (rows,1), (1,cols) or (rows,cols)."""
    rows, cols = x2.shape
    srows, scols = s2.shape
    itemsize = max(jnp.dtype(x2.dtype).itemsize, jnp.dtype(out_dtype).itemsize)
    align = max(_sublane_align(x2.dtype), _sublane_align(s2.dtype),
                _sublane_align(out_dtype))

    tile_bytes, vmem_limit = _budgets()
    if srows > 1 and scols > 1:            # 3 big HBM streams instead of 2
        tile_bytes = (tile_bytes * 2) // 3
    tile_elems = max(align * 128, tile_bytes // itemsize)

    # Lane-dense first: give the lane axis most of the per-tile budget.
    min_rows = min(rows, align)
    lane_target = max(128, ((tile_elems // max(min_rows, 1)) // 128) * 128)
    lane_tile = min(cols, lane_target)        # full extent allowed if cols < target
    row_budget = max(1, tile_elems // lane_tile)
    row_tile = min(rows, max(min_rows, (row_budget // align) * align))

    n_rb = pl.cdiv(rows, row_tile)
    n_cb = pl.cdiv(cols, lane_tile)

    # v7x has 2 TensorCores: make sure a non-trivial tensor splits into >= 2 blocks.
    if n_rb * n_cb == 1 and rows * cols * itemsize >= (1 << 20):
        if rows >= 2 * align:
            row_tile = align * pl.cdiv(pl.cdiv(rows, 2), align)
            n_rb = pl.cdiv(rows, row_tile)
        elif cols >= 2 * 128:
            lane_tile = 128 * pl.cdiv(pl.cdiv(cols, 2), 128)
            n_cb = pl.cdiv(cols, lane_tile)

    row_varying = srows > 1
    col_varying = scols > 1
    xo_block = (row_tile, lane_tile)

    if col_varying and not row_varying:
        # Row axis is the fastest grid axis, so the (1, lane_tile) scale block
        # keeps the same block index across consecutive steps (no re-DMA).
        grid = (n_cb, n_rb)
        x_spec = pl.BlockSpec(xo_block, lambda j, i: (i, j))
        s_spec = pl.BlockSpec((1, lane_tile), lambda j, i: (0, j))
        o_spec = pl.BlockSpec(xo_block, lambda j, i: (i, j))
    else:
        grid = (n_rb, n_cb)
        x_spec = pl.BlockSpec(xo_block, lambda i, j: (i, j))
        o_spec = pl.BlockSpec(xo_block, lambda i, j: (i, j))
        if row_varying and col_varying:
            s_spec = pl.BlockSpec(xo_block, lambda i, j: (i, j))
        elif row_varying:
            # Column axis fastest -> the (row_tile, 1) scale block is reused.
            s_spec = pl.BlockSpec((row_tile, 1), lambda i, j: (i, 0))
        else:
            s_spec = pl.BlockSpec((1, 1), lambda i, j: (0, 0))

    total = rows * cols
    cost = pl.CostEstimate(
        flops=total,
        transcendentals=0,
        bytes_accessed=total * (jnp.dtype(x2.dtype).itemsize
                                + jnp.dtype(out_dtype).itemsize)
        + srows * scols * jnp.dtype(s2.dtype).itemsize,
    )

    return pl.pallas_call(
        _mul_kernel,
        out_shape=jax.ShapeDtypeStruct((rows, cols), out_dtype),
        grid_spec=pltpu.PrefetchScalarGridSpec(
            num_scalar_prefetch=0,
            grid=grid,
            in_specs=[x_spec, s_spec],
            out_specs=o_spec,
        ),
        compiler_params=pltpu.CompilerParams(
            dimension_semantics=("parallel", "parallel"),
            vmem_limit_bytes=vmem_limit),
        cost_estimate=cost,
    )(x2, s2)


def scale_forward(x, scale):
    """Pallas equivalent of Scale.forward for an NCHW tensor x."""
    N, C, H, W = x.shape
    scale = jnp.asarray(scale)
    out_dtype = jnp.result_type(x.dtype, scale.dtype)   # torch-like promotion

    if scale.ndim == 1:
        # torch branch 1: scale[None,:,None,None].expand_as(x) * x  (len C or 1)
        s4 = jnp.broadcast_to(scale.reshape(1, -1, 1, 1), (1, C, 1, 1))
    else:
        assert scale.ndim <= 4, "scale rank > 4 not supported"
        s4 = scale.reshape((1,) * (4 - scale.ndim) + tuple(scale.shape))
        for sd, xd in zip(s4.shape, x.shape):
            assert sd in (1, xd), (
                f"scale shape {scale.shape} not broadcastable to {x.shape}")

    b0, b1, b2, b3 = s4.shape
    if (b0, b1, b2, b3) == (1, 1, 1, 1):
        # Scalar scale: single (1,1) operand broadcast in-kernel.
        x2 = x.reshape(N, C * H * W)
        s2 = s4.reshape(1, 1)
    elif b0 == 1:
        # Scale does not vary over N (per-channel, spatial, (C,H,W), ...):
        # lane-dense (N, C*H*W) view + compact (1, C*H*W) scale row, reused
        # across the N axis via the BlockSpec index_map.
        x2 = x.reshape(N, C * H * W)
        s2 = jnp.broadcast_to(s4, (1, C, H, W)).reshape(1, C * H * W)
    elif b2 == 1 and b3 == 1:
        # Scale varies over N (and maybe C) but not spatially: (N*C, 1) column.
        x2 = x.reshape(N * C, H * W)
        s2 = jnp.broadcast_to(s4, (N, C, 1, 1)).reshape(N * C, 1)
    else:
        # Rare non-factorable broadcast (varies over N *and* over C/H/W, e.g.
        # (N,1,H,W)): materialise the broadcast and do a same-shape multiply.
        x2 = x.reshape(N, C * H * W)
        s2 = jnp.broadcast_to(s4, (N, C, H, W)).reshape(N, C * H * W)

    out2 = _tiled_mul_2d(x2, s2, out_dtype)
    return out2.reshape(N, C, H, W)


if __name__ == "__main__":
    key = jax.random.PRNGKey(0)
    kx, ks, k2 = jax.random.split(key, 3)

    N, C, H, W = 2, 4, 16, 16
    x = jax.random.normal(kx, (N, C, H, W), dtype=jnp.float32)

    # 1) 1-D per-channel scale (the main torch branch).
    s_c = jax.random.uniform(ks, (C,), dtype=jnp.float32, minval=0.5, maxval=1.5)
    out = jax.block_until_ready(scale_forward(x, s_c))
    ref = s_c[None, :, None, None] * x
    assert out.shape == x.shape and out.dtype == x.dtype
    assert jnp.allclose(out, ref, atol=1e-6, rtol=1e-6)

    # 2) else-branch: scalar scale.
    out_s = jax.block_until_ready(scale_forward(x, jnp.float32(1.7)))
    assert jnp.allclose(out_s, jnp.float32(1.7) * x, atol=1e-6, rtol=1e-6)

    # 3) else-branch: spatial scale (1,1,H,W) -- compact column-form, no
    #    full-size broadcast materialised.
    s_hw = jax.random.uniform(k2, (1, 1, H, W), dtype=jnp.float32,
                              minval=0.5, maxval=1.5)
    out_hw = jax.block_until_ready(scale_forward(x, s_hw))
    assert jnp.allclose(out_hw, s_hw * x, atol=1e-6, rtol=1e-6)

    # 4) else-branch: per-sample scale (N,1,1,1) -- row-form.
    s_n = jnp.arange(1, N + 1, dtype=jnp.float32).reshape(N, 1, 1, 1)
    out_n = jax.block_until_ready(scale_forward(x, s_n))
    assert jnp.allclose(out_n, s_n * x, atol=1e-6, rtol=1e-6)

    # 5) else-branch: non-factorable broadcast (N,1,H,W) fallback.
    s_nhw = jax.random.uniform(jax.random.PRNGKey(3), (N, 1, H, W),
                               dtype=jnp.float32, minval=0.5, maxval=1.5)
    out_f = jax.block_until_ready(scale_forward(x, s_nhw))
    assert jnp.allclose(out_f, s_nhw * x, atol=1e-6, rtol=1e-6)

    # 6) ragged spatial size (H*W not a multiple of 128) + dtype promotion
    #    (bf16 x, f32 scale -> f32 out, matching torch).
    xb = jax.random.normal(jax.random.PRNGKey(4), (2, 5, 7, 7), dtype=jnp.bfloat16)
    s5 = jax.random.uniform(jax.random.PRNGKey(5), (5,), dtype=jnp.float32,
                            minval=0.5, maxval=1.5)
    out_b = jax.block_until_ready(scale_forward(xb, s5))
    ref_b = s5[None, :, None, None] * xb.astype(jnp.float32)
    assert out_b.dtype == jnp.float32
    assert jnp.allclose(out_b, ref_b, atol=1e-6, rtol=1e-6)

    print("KERNEL_OK")
</pallas_src>

<mosaic_0001>
module attributes {stable_mosaic.version = 11 : i64} {
  func.func @_mul_kernel(%arg0: i32, %arg1: i32, %arg2: memref<2x1024xf32, #tpu.memory_space<vmem>>, %arg3: memref<1x1024xf32, #tpu.memory_space<vmem>>, %arg4: memref<2x1024xf32, #tpu.memory_space<vmem>>) attributes {dimension_semantics = [#tpu.dimension_semantics<parallel>, #tpu.dimension_semantics<parallel>], iteration_bounds = array<i64: 1, 1>, scalar_prefetch = 0 : i64, scratch_operands = 0 : i64, tpu.core_type = #tpu.core_type<tc>, window_params = [{transform_indices = @transform_0, window_bounds = array<i64: 2, 1024>}, {transform_indices = @transform_1, window_bounds = array<i64: 1, 1024>}, {transform_indices = @transform_2, window_bounds = array<i64: 2, 1024>}]} {
    %c0 = arith.constant 0 : index
    %c0_0 = arith.constant 0 : index
    %0 = vector.load %arg2[%c0, %c0_0] : memref<2x1024xf32, #tpu.memory_space<vmem>>, vector<2x1024xf32>
    %c0_1 = arith.constant 0 : index
    %c0_2 = arith.constant 0 : index
    %1 = vector.load %arg3[%c0_1, %c0_2] : memref<1x1024xf32, #tpu.memory_space<vmem>>, vector<1x1024xf32>
    %2 = vector.broadcast %1 : vector<1x1024xf32> to vector<2x1024xf32>
    %3 = arith.mulf %0, %2 : vector<2x1024xf32>
    %c0_3 = arith.constant 0 : index
    %c0_4 = arith.constant 0 : index
    %4 = vector.load %arg4[%c0_3, %c0_4] : memref<2x1024xf32, #tpu.memory_space<vmem>>, vector<2x1024xf32>
    tpu.vector_store %arg4[%c0_3, %c0_4], %3 {strides = array<i32>} : memref<2x1024xf32, #tpu.memory_space<vmem>>, vector<2x1024xf32>,
    return
  }
  func.func @transform_0(%arg0: i32, %arg1: i32) -> (i32, i32) {
    %c0_i32 = arith.constant 0 : i32
    return %arg1, %arg0 : i32, i32
  }
  func.func @transform_1(%arg0: i32, %arg1: i32) -> (i32, i32) {
    %c0_i32 = arith.constant 0 : i32
    %c0_i32_0 = arith.constant 0 : i32
    return %c0_i32, %arg0 : i32, i32
  }
  func.func @transform_2(%arg0: i32, %arg1: i32) -> (i32, i32) {
    %c0_i32 = arith.constant 0 : i32
    return %arg1, %arg0 : i32, i32
  }
}

</mosaic_0001>

<bundles_post_ra>
// kernel: tpu_custom_call.1
= control target key start
LH: loop header
LB: loop body
LE: loop exit
PB: predicated region body
PF: predicated region fallthrough
CT: control target
= control target key end

     0   :  { %7 = vsyncpa [#allocation3], 0  ;;  %s259_s0 = inlined_call_operand.hbm [shape: f32[2,1024], index: 0, kind: input, shape index: {}]   ;;  %s260_s1 = inlined_call_operand.hbm [shape: f32[1,1024], index: 1, kind: input, shape index: {}]   ;;  %s261_s2 = inlined_call_operand.hbm [shape: f32[2,1024], index: 2, kind: output, shape index: {}]  }
   0x1   :  { %8 = vsyncpa [#allocation6], 0 }
   0x2   :  { %9 = vsyncpa [#allocation4], 0  ;;  %s204_s9 = smov [#allocation2]   ;;  %s205_s11 = smov [#allocation5]  }
   0x3   :  { %s16_s10 = sshll.u32 %s204_s9, 4  ;;  %s26_s12 = sshll.u32 %s205_s11, 4  ;;  %s17_s10 = int_to_ptr.vmem [resolvable:$true] %s16_s10  ;;  %s27_s12 = int_to_ptr.vmem [resolvable:$true] %s26_s12 }
   0x4   :  { %s132_s15 = scalar_lea.hbm %s259_s0, 256 }
   0x5   :  { %p133_p0 = scmp.ne.s32.totalorder %s259_s0, %s132_s15  ;;  %p136_p1 = scmp.lt.u32.totalorder %s132_s15, %s259_s0 }
   0x7   :  { %p138_p2 = pnand %p136_p1, %p133_p0 }
   0x9   :  { %141 = shalt.err (!%p138_p2)
}
   0xa   :  { %s142_s20 = scalar_lea.vmem %s17_s10, 256  ;;  %p147_p4 = scmp.lt.s32.totalorder %s17_s10, %s17_s10 }
   0xb   :  { %p143_p3 = scmp.ne.s32.totalorder %s17_s10, %s142_s20  ;;  %p148_p5 = scmp.lt.s32.totalorder %s142_s20, %s142_s20 }
   0xd   :  { %p149_p6 = por %p148_p5, %p147_p4 }
   0xf   :  { %p150_p7 = pnand %p149_p6, %p143_p3 }
  0x11   :  { %153 = shalt.err (!%p150_p7)
}
  0x12   :  { %19 = dma.hbm_to_vmem [thread:$0]  %s259_s0, 256, %s17_s10, [#allocation3]  }
  0x13   :  { %s154_s25 = scalar_lea.hbm %s260_s1, 128 }
  0x14   :  { %p155_p8 = scmp.ne.s32.totalorder %s260_s1, %s154_s25  ;;  %p158_p9 = scmp.lt.u32.totalorder %s154_s25, %s260_s1 }
  0x16   :  { %p160_p10 = pnand %p158_p9, %p155_p8 }
  0x18   :  { %163 = shalt.err (!%p160_p10)
}
  0x19   :  { %s164_s30 = scalar_lea.vmem %s27_s12, 128  ;;  %p169_p12 = scmp.lt.s32.totalorder %s27_s12, %s27_s12 }
  0x1a   :  { %p165_p11 = scmp.ne.s32.totalorder %s27_s12, %s164_s30  ;;  %p170_p13 = scmp.lt.s32.totalorder %s164_s30, %s164_s30 }
  0x1c   :  { %p171_p0 = por %p170_p13, %p169_p12 }
  0x1e   :  { %p172_p1 = pnand %p171_p0, %p165_p11 }
  0x20   :  { %175 = shalt.err (!%p172_p1)
}
  0x21   :  { %29 = dma.hbm_to_vmem [thread:$0]  %s260_s1, 128, %s27_s12, [#allocation6]  }
  0x22   :  { %198 = dma.done.wait [#allocation3], 256  }
  0x23   :  { %199 = vsyncadd [#allocation3], 4294967040 }
  0x24   :  { %200 = dma.done.wait [#allocation6], 128  }
  0x25   :  { %201 = vsyncadd [#allocation6], 4294967168  ;;  %v40_v0 = vlaneseq  ;;  %v206_v1 = vmov 1983009808   ;;  %v38_v13 = vld [vmem:[#allocation5] sm:$0xff]  ;;  %v36_v29 = vld [vmem:[#allocation2] sm:$0xff] }
  0x26   :  { %v75_v2 = vunpack.c.l.s4 %v206_v1  ;;  %v37_v33 = vld [vmem:[#allocation2 + $0x8] sm:$0xff]  ;;  %s207_s1 = smov [#allocation7]  }
  0x27   :  { %v41_v3 = vshrl.u32 %v40_v0, 7  ;;  %s118_s4 = sshll.u32 %s207_s1, 4  ;;  %s119_s4 = int_to_ptr.vmem [resolvable:$true] %s118_s4 }
  0x28   :  { %v76_v4 = vunpack.c.0.s8 %v75_v2  ;;  %s176_s5 = scalar_lea.vmem %s119_s4, 256  ;;  %p181_p3 = scmp.lt.s32.totalorder %s119_s4, %s119_s4 }
  0x29   :  { %v42_v5 = vsub.s32 0, %v41_v3  ;;  %v46_v6 = vsub.s32 1, %v41_v3  ;;  %v50_v7 = vsub.s32 2, %v41_v3  ;;  %v54_v8 = vsub.s32 3, %v41_v3  ;;  %p177_p2 = scmp.ne.s32.totalorder %s119_s4, %s176_s5  ;;  %p182_p4 = scmp.lt.s32.totalorder %s176_s5, %s176_s5 }
  0x2a   :  { %v58_v9 = vsub.s32 4, %v41_v3  ;;  %v62_v10 = vsub.s32 5, %v41_v3  ;;  %v66_v11 = vsub.s32 6, %v41_v3  ;;  %v70_v12 = vsub.s32 7, %v41_v3 }
  0x2b   :  { %v79_v14 = vsub.s32 %v76_v4, %v41_v3  ;;  %v43_v15 = vrot.slane %v38_v13, %v42_v5  ;;  %v47_v16 = vrot.slane %v38_v13, %v46_v6  ;;  %v51_v17 = vrot.slane %v38_v13, %v50_v7  ;;  %p183_p5 = por %p182_p4, %p181_p3 }
  0x2c   :  { %v55_v18 = vrot.slane %v38_v13, %v54_v8  ;;  %v59_v19 = vrot.slane %v38_v13, %v58_v9  ;;  %v63_v20 = vrot.slane %v38_v13, %v62_v10  ;;  %v67_v21 = vrot.slane %v38_v13, %v66_v11 }
  0x2d   :  { %v71_v22 = vrot.slane %v38_v13, %v70_v12  ;;  %v72_v23 = vcombine.low %v43_v15, %v47_v16  ;;  %p184_p6 = pnand %p183_p5, %p177_p2 }
  0x2e   :  { %v73_v24 = vcombine.low %v51_v17, %v55_v18  ;;  %v89_v25 = vcombine.low %v59_v19, %v63_v20 }
  0x2f   :  { %v90_v26 = vcombine.low %v67_v21, %v71_v22  ;;  %v80_v27 = vrot.slane %v72_v23, %v79_v14 }
  0x30   :  { %v87_v28 = vrot.slane %v73_v24, %v79_v14  ;;  %v97_v30 = vrot.slane %v89_v25, %v79_v14 }
  0x31   :  { %v104_v31 = vrot.slane %v90_v26, %v79_v14 }
  0x32   :  { %v88_v32 = vcombine.low %v80_v27, %v87_v28 }
  0x33   :  { %v105_v34 = vcombine.low %v97_v30, %v104_v31 }
  0x34   :  { %v108_v35 = vmul.f32 %v88_v32, %v36_v29 }
  0x35   :  { %v109_v36 = vmul.f32 %v105_v34, %v37_v33 }
  0x36   :  { %110 = vst [vmem:[#allocation7] sm:$0xff] %v108_v35 }
  0x37   :  { %111 = vst [vmem:[#allocation7 + $0x8] sm:$0xff] %v109_v36 }
  0x38   :  { %187 = shalt.err (!%p184_p6)
}
  0x39   :  { %s188_s8 = scalar_lea.hbm %s261_s2, 256 }
  0x3a   :  { %p189_p7 = scmp.ne.s32.totalorder %s261_s2, %s188_s8  ;;  %p192_p8 = scmp.lt.u32.totalorder %s188_s8, %s261_s2 }
  0x3c   :  { %p194_p9 = pnand %p192_p8, %p189_p7 }
  0x3e   :  { %197 = shalt.err (!%p194_p9)
}
  0x3f   :  { %121 = dma.vmem_to_hbm [thread:$0]  %s119_s4, 256, %s261_s2, [#allocation4]  }
  0x40   :  { %202 = dma.done.wait [#allocation4], 256  }
  0x41   :  { %203 = vsyncadd [#allocation4], 4294967040 }
  0x42   :  { %125 = vsyncpa [#allocation3], 1 }
  0x43   :  { %126 = vsyncpa [#allocation6], 1 }
  0x44   :  { %127 = vsyncpa [#allocation4], 1 }

</bundles_post_ra>
